<compile_context>
chip_gen: v6e
topology: v6e:2x2x1
jax: 0.10.0
libtpu: 0.0.40
codegen_flags: <defaults>
</compile_context>

<pallas_src>
import jax
import jax.numpy as jnp
from jax.experimental import pallas as pl
from jax.experimental.pallas import tpu as pltpu


# -----------------------------------------------------------------------------
# Path 1 (default): zero-traffic identity.  Output HBM buffer IS the input
# buffer, so the kernel has nothing to do.
# -----------------------------------------------------------------------------
def _identity_noop_kernel(x_hbm_ref, o_hbm_ref):
    # input_output_aliases={0: 0} makes o_hbm_ref the same HBM buffer as
    # x_hbm_ref; a pure identity therefore needs no loads, stores, or DMA.
    del x_hbm_ref, o_hbm_ref  # intentional no-op body


def _pallas_identity_inplace(x: jax.Array) -> jax.Array:
    return pl.pallas_call(
        _identity_noop_kernel,
        out_shape=jax.ShapeDtypeStruct(x.shape, x.dtype),
        in_specs=[pl.BlockSpec(memory_space=pl.ANY)],
        out_specs=pl.BlockSpec(memory_space=pl.ANY),
        input_output_aliases={0: 0},
        cost_estimate=pl.CostEstimate(flops=0, transcendentals=0, bytes_accessed=0),
        compiler_params=pltpu.CompilerParams(has_side_effects=True),
    )(x)


# -----------------------------------------------------------------------------
# Path 2 (optional): a real data move into a fresh buffer, done as one direct
# HBM->HBM DMA (no VMEM staging, no layout / divisibility constraints).
# -----------------------------------------------------------------------------
def _hbm_copy_kernel(x_hbm_ref, o_hbm_ref, copy_sem):
    cp = pltpu.make_async_copy(x_hbm_ref, o_hbm_ref, copy_sem)
    cp.start()
    cp.wait()


def _pallas_hbm_copy(x: jax.Array) -> jax.Array:
    return pl.pallas_call(
        _hbm_copy_kernel,
        out_shape=jax.ShapeDtypeStruct(x.shape, x.dtype),
        in_specs=[pl.BlockSpec(memory_space=pl.ANY)],
        out_specs=pl.BlockSpec(memory_space=pl.ANY),
        scratch_shapes=[pltpu.SemaphoreType.DMA(())],
        cost_estimate=pl.CostEstimate(
            flops=0, transcendentals=0, bytes_accessed=2 * x.nbytes
        ),
    )(x)


# -----------------------------------------------------------------------------
# Public wrapper matching IdentityMobileViTTransformerLayer.forward semantics.
# -----------------------------------------------------------------------------
def identity_mobilevit_transformer_layer(
    hidden_states: jax.Array,
    *args,
    use_pallas: bool = True,
    materialize_copy: bool = False,
    **kwargs,
) -> jax.Array:
    """Pallas equivalent of IdentityMobileViTTransformerLayer.forward.

    forward(hidden_states, *args, **kwargs) -> hidden_states

    use_pallas=False      : the truly optimal implementation (no kernel at all).
    materialize_copy=True : force a fresh output buffer via one HBM->HBM DMA.
    Default               : zero-traffic aliased no-op pallas_call.  For the
                            full win, the caller should donate hidden_states
                            (jax.jit(..., donate_argnums=0)); otherwise XLA
                            inserts one defensive copy before the aliased call.
    """
    del args, kwargs  # the PyTorch module ignores extra args
    if not use_pallas or hidden_states.size == 0:
        return hidden_states
    if materialize_copy:
        return _pallas_hbm_copy(hidden_states)
    return _pallas_identity_inplace(hidden_states)


if __name__ == "__main__":
    key = jax.random.PRNGKey(0)
    k0, k1, k2 = jax.random.split(key, 3)

    # MobileViT transformer-layer hidden_states: (batch * num_patches, seq, hidden).
    x = jax.random.normal(k0, (2, 8, 32), dtype=jnp.float32)
    y = jax.block_until_ready(identity_mobilevit_transformer_layer(x))
    assert y.shape == x.shape and y.dtype == x.dtype
    assert bool(jnp.all(y == x))

    # Donated + jitted call: output buffer aliases the donated input buffer,
    # so the identity moves zero bytes of HBM.
    x_don = jax.random.normal(k1, (4, 64, 128), dtype=jnp.bfloat16)
    x_keep = jnp.copy(x_don)  # independent buffer kept for comparison
    jitted = jax.jit(
        lambda h: identity_mobilevit_transformer_layer(h), donate_argnums=0
    )
    y_don = jax.block_until_ready(jitted(x_don))
    assert y_don.shape == x_keep.shape and y_don.dtype == x_keep.dtype
    assert bool(jnp.all(y_don == x_keep))

    # Materialized-copy path: one direct HBM->HBM DMA.  Works for ragged /
    # non-128-divisible shapes and sub-32-bit dtypes (no BlockSpec tiling).
    x_odd = jax.random.normal(k2, (3, 7, 33), dtype=jnp.bfloat16)
    y_odd = jax.block_until_ready(
        identity_mobilevit_transformer_layer(x_odd, materialize_copy=True)
    )
    assert y_odd.shape == x_odd.shape and y_odd.dtype == x_odd.dtype
    assert bool(jnp.all(y_odd == x_odd))

    x_big = jax.random.normal(jax.random.PRNGKey(3), (8, 256, 256), dtype=jnp.float32)
    y_big = jax.block_until_ready(
        identity_mobilevit_transformer_layer(x_big, materialize_copy=True)
    )
    assert y_big.shape == x_big.shape and y_big.dtype == x_big.dtype
    assert bool(jnp.all(y_big == x_big))

    print("KERNEL_OK")
</pallas_src>

<mosaic_0001>
module attributes {stable_mosaic.version = 11 : i64} {
  func.func @_identity_noop_kernel(%arg0: memref<2x8x32xf32, #tpu.memory_space<any>>, %arg1: memref<2x8x32xf32, #tpu.memory_space<any>>) attributes {dimension_semantics = [], scalar_prefetch = 0 : i64, scratch_operands = 0 : i64, tpu.core_type = #tpu.core_type<tc>} {
    return
  }
}

</mosaic_0001>

<bundles_post_ra>
// kernel: tpu_custom_call.1
= control target key start
LH: loop header
LB: loop body
LE: loop exit
PB: predicated region body
PF: predicated region fallthrough
CT: control target
= control target key end

     0   :  { %s16_s0 = inlined_call_operand.hbm [shape: f32[2,8,32], index: 0, kind: input, shape index: {}, may-alias: {0,1}]   ;;  %s17_s1 = inlined_call_operand.hbm [shape: f32[2,8,32], index: 1, kind: output, shape index: {}, may-alias: {0,1}]  }

</bundles_post_ra>
